<compile_context>
chip_gen: v7x
topology: tpu7x:2x2x1
jax: 0.10.0
libtpu: 0.0.40
codegen_flags: <defaults>
</compile_context>

<pallas_src>
import jax
import jax.numpy as jnp
from jax.experimental import pallas as pl
from jax.experimental.pallas import tpu as pltpu


# Per-buffer tile budget: 4 MiB.  Double-buffered input + output = 4 buffers
# = 16 MiB, which fits the default scoped VMEM limit on v5e/v6e/v7x.
_TILE_BYTES_BUDGET = 4 * 1024 * 1024
_LANE_CANDIDATES = (1024, 512, 256, 128)


def _route_copy_kernel(src_ref, dst_ref):
    # Pure routing: stream the buffered feature map through VMEM.
    dst_ref[...] = src_ref[...]


def _largest_divisor_at_most(n: int, cap: int) -> int:
    """Largest divisor of n that is <= cap (>= 1)."""
    cap = max(1, min(n, cap))
    best = 1
    i = 1
    while i * i <= n:
        if n % i == 0:
            lo, hi = i, n // i
            if lo <= cap and lo > best:
                best = lo
            if hi <= cap and hi > best:
                best = hi
        i += 1
    return best


def _pallas_route_copy_2d(feat_2d: jax.Array, tile_rows: int) -> jax.Array:
    """Tiled identity copy of a 2-D slab via a Pallas kernel."""
    rows, cols = feat_2d.shape
    assert rows % tile_rows == 0
    grid = (rows // tile_rows,)
    nbytes = feat_2d.size * feat_2d.dtype.itemsize
    return pl.pallas_call(
        _route_copy_kernel,
        out_shape=jax.ShapeDtypeStruct((rows, cols), feat_2d.dtype),
        grid=grid,
        in_specs=[pl.BlockSpec((tile_rows, cols), lambda i: (i, 0))],
        out_specs=pl.BlockSpec((tile_rows, cols), lambda i: (i, 0)),
        compiler_params=pltpu.CompilerParams(
            dimension_semantics=("parallel",),
        ),
        cost_estimate=pl.CostEstimate(
            flops=0, transcendentals=0, bytes_accessed=2 * nbytes
        ),
    )(feat_2d)


def route_copy(feat: jax.Array) -> jax.Array:
    """Materialize a routed feature map via a lane-dense, tiled Pallas copy."""
    orig_shape = feat.shape
    total = int(feat.size)
    itemsize = int(jnp.dtype(feat.dtype).itemsize)

    # Pick the widest lane dim L (multiple of 128) such that rows = total // L
    # is a multiple of 8 -> blocks satisfy the (8, 128) tiling constraint and
    # stores are unmasked and lane-dense.
    lane = None
    for cand in _LANE_CANDIDATES:
        if total % (cand * 8) == 0:
            lane = cand
            break

    if lane is None:
        # Irregular element count: fall back to a full-extent single block on
        # the natural (N*C*H, W) view (always legal; slow path, small tensors).
        w = orig_shape[-1]
        rows = total // w
        feat_2d = feat.reshape(rows, w)
        out_2d = _pallas_route_copy_2d(feat_2d, tile_rows=rows)
        return out_2d.reshape(orig_shape)

    rows = total // lane

    # Largest tile (multiple of 8 rows, exact divisor of rows) under budget.
    budget_rows = max(8, (_TILE_BYTES_BUDGET // (lane * itemsize)) // 8 * 8)
    m = rows // 8
    tile_rows = 8 * _largest_divisor_at_most(m, budget_rows // 8)

    feat_2d = feat.reshape(rows, lane)  # contiguous reshape: free at XLA level
    out_2d = _pallas_route_copy_2d(feat_2d, tile_rows)
    return out_2d.reshape(orig_shape)


class RouteLayer:
    """JAX/Pallas equivalent of yolov3 RouteLayer.

    forward(x, buffer, targets) -> (buffer[name], buffer)
    The routed tensor is materialized through a tiled Pallas copy kernel.
    """

    def __init__(self, name):
        self.name = name

    def forward(self, x, buffer, targets):
        routed = route_copy(buffer[self.name])
        return routed, buffer

    __call__ = forward


if __name__ == "__main__":
    key = jax.random.PRNGKey(0)
    k_x, k_b0, k_b1 = jax.random.split(key, 3)

    # Small, deterministic inputs consistent with conv-style activations.
    N, C, H, W = 2, 4, 16, 16
    x = jax.random.normal(k_x, (N, C, H, W), dtype=jnp.float32)

    # Buffer of previously produced layer outputs, keyed by layer name.
    buffer = {
        "layer_0": jax.random.normal(k_b0, (N, C, H, W), dtype=jnp.float32),
        "layer_1": jax.random.normal(k_b1, (N, 2 * C, H, W), dtype=jnp.float32),
    }
    targets = None  # unused by RouteLayer, kept for signature parity

    layer = RouteLayer(name="layer_1")
    routed, out_buffer = layer(x, buffer, targets)
    routed = jax.block_until_ready(routed)

    # Correctness: routed == buffer[name]; buffer object returned unchanged.
    assert routed.shape == buffer["layer_1"].shape
    assert routed.dtype == buffer["layer_1"].dtype
    assert bool(jnp.array_equal(routed, buffer["layer_1"]))
    assert out_buffer is buffer

    # Also exercise the other routed entry (different lane factorization).
    routed0 = jax.block_until_ready(RouteLayer("layer_0")(x, buffer, targets)[0])
    assert bool(jnp.array_equal(routed0, buffer["layer_0"]))

    print("KERNEL_OK")
</pallas_src>

<mosaic_0001>
module attributes {stable_mosaic.version = 11 : i64} {
  func.func @_route_copy_kernel(%arg0: i32, %arg1: memref<8x512xf32, #tpu.memory_space<vmem>>, %arg2: memref<8x512xf32, #tpu.memory_space<vmem>>) attributes {dimension_semantics = [#tpu.dimension_semantics<parallel>], iteration_bounds = array<i64: 1>, scalar_prefetch = 0 : i64, scratch_operands = 0 : i64, tpu.core_type = #tpu.core_type<tc>, window_params = [{transform_indices = @transform_0, window_bounds = array<i64: 8, 512>}, {transform_indices = @transform_1, window_bounds = array<i64: 8, 512>}]} {
    %c0 = arith.constant 0 : index
    %c0_0 = arith.constant 0 : index
    %0 = vector.load %arg1[%c0, %c0_0] : memref<8x512xf32, #tpu.memory_space<vmem>>, vector<8x512xf32>
    %c0_1 = arith.constant 0 : index
    %c0_2 = arith.constant 0 : index
    %1 = vector.load %arg2[%c0_1, %c0_2] : memref<8x512xf32, #tpu.memory_space<vmem>>, vector<8x512xf32>
    tpu.vector_store %arg2[%c0_1, %c0_2], %0 {strides = array<i32>} : memref<8x512xf32, #tpu.memory_space<vmem>>, vector<8x512xf32>,
    return
  }
  func.func @transform_0(%arg0: i32) -> (i32, i32) {
    %c0_i32 = arith.constant 0 : i32
    %c0_i32_0 = arith.constant 0 : i32
    return %arg0, %c0_i32 : i32, i32
  }
  func.func @transform_1(%arg0: i32) -> (i32, i32) {
    %c0_i32 = arith.constant 0 : i32
    %c0_i32_0 = arith.constant 0 : i32
    return %arg0, %c0_i32 : i32, i32
  }
}

</mosaic_0001>

<bundles_post_ra>
// kernel: tpu_custom_call.1
= control target key start
LH: loop header
LB: loop body
LE: loop exit
PB: predicated region body
PF: predicated region fallthrough
CT: control target
= control target key end

     0   :  { %6 = vsyncpa [#allocation3], 0  ;;  %s130_s0 = inlined_call_operand.hbm [shape: f32[8,512], index: 0, kind: input, shape index: {}]   ;;  %s131_s1 = inlined_call_operand.hbm [shape: f32[8,512], index: 1, kind: output, shape index: {}]  }
   0x1   :  { %7 = vsyncpa [#allocation4], 0  ;;  %s94_s6 = smov [#allocation2]   ;;  %s46_s10 = scalar_lea.hbm %s130_s0, 512 }
   0x2   :  { %s14_s7 = sshll.u32 %s94_s6, 4  ;;  %p47_p0 = scmp.ne.s32.totalorder %s130_s0, %s46_s10  ;;  %s15_s7 = int_to_ptr.vmem [resolvable:$true] %s14_s7 }
   0x3   :  { %p50_p1 = scmp.lt.u32.totalorder %s46_s10, %s130_s0 }
   0x5   :  { %p52_p2 = pnand %p50_p1, %p47_p0 }
   0x7   :  { %55 = shalt.err (!%p52_p2)
}
   0x8   :  { %s56_s15 = scalar_lea.vmem %s15_s7, 512  ;;  %p61_p4 = scmp.lt.s32.totalorder %s15_s7, %s15_s7 }
   0x9   :  { %p57_p3 = scmp.ne.s32.totalorder %s15_s7, %s56_s15  ;;  %p62_p5 = scmp.lt.s32.totalorder %s56_s15, %s56_s15 }
   0xb   :  { %p63_p6 = por %p62_p5, %p61_p4 }
   0xd   :  { %p64_p7 = pnand %p63_p6, %p57_p3 }
   0xf   :  { %67 = shalt.err (!%p64_p7)
}
  0x10   :  { %17 = dma.hbm_to_vmem [thread:$0]  %s130_s0, 512, %s15_s7, [#allocation3]  }
  0x11   :  { %90 = dma.done.wait [#allocation3], 512  }
  0x12   :  { %91 = vsyncadd [#allocation3], 4294966784  ;;  %s95_s18 = smov [#allocation5]   ;;  %v21_v0 = vld [vmem:[#allocation2] sm:$0xff]  ;;  %v22_v1 = vld [vmem:[#allocation2 + $0x8] sm:$0xff] }
  0x13   :  { %s35_s19 = sshll.u32 %s95_s18, 4  ;;  %v23_v2 = vld [vmem:[#allocation2 + $0x10] sm:$0xff]  ;;  %25 = vst [vmem:[#allocation5] sm:$0xff] %v21_v0  ;;  %26 = vst [vmem:[#allocation5 + $0x8] sm:$0xff] %v22_v1  ;;  %v24_v3 = vld [vmem:[#allocation2 + $0x18] sm:$0xff]  ;;  %s36_s19 = int_to_ptr.vmem [resolvable:$true] %s35_s19 }
  0x14   :  { %27 = vst [vmem:[#allocation5 + $0x10] sm:$0xff] %v23_v2  ;;  %28 = vst [vmem:[#allocation5 + $0x18] sm:$0xff] %v24_v3  ;;  %s68_s20 = scalar_lea.vmem %s36_s19, 512  ;;  %p73_p9 = scmp.lt.s32.totalorder %s36_s19, %s36_s19 }
  0x15   :  { %p69_p8 = scmp.ne.s32.totalorder %s36_s19, %s68_s20  ;;  %p74_p10 = scmp.lt.s32.totalorder %s68_s20, %s68_s20 }
  0x17   :  { %p75_p11 = por %p74_p10, %p73_p9 }
  0x19   :  { %p76_p12 = pnand %p75_p11, %p69_p8 }
  0x1b   :  { %79 = shalt.err (!%p76_p12)
}
  0x1c   :  { %s80_s22 = scalar_lea.hbm %s131_s1, 512 }
  0x1d   :  { %p81_p13 = scmp.ne.s32.totalorder %s131_s1, %s80_s22  ;;  %p84_p0 = scmp.lt.u32.totalorder %s80_s22, %s131_s1 }
  0x1f   :  { %p86_p1 = pnand %p84_p0, %p81_p13 }
  0x21   :  { %89 = shalt.err (!%p86_p1)
}
  0x22   :  { %38 = dma.vmem_to_hbm [thread:$0]  %s36_s19, 512, %s131_s1, [#allocation4]  }
  0x23   :  { %92 = dma.done.wait [#allocation4], 512  }
  0x24   :  { %93 = vsyncadd [#allocation4], 4294966784 }
  0x25   :  { %42 = vsyncpa [#allocation3], 1 }
  0x26   :  { %43 = vsyncpa [#allocation4], 1 }

</bundles_post_ra>
